<compile_context>
chip_gen: v7x
topology: tpu7x:2x2x1
jax: 0.10.0
libtpu: 0.0.40
codegen_flags: <defaults>
</compile_context>

<pallas_src>
import jax
import jax.numpy as jnp
from jax.experimental import pallas as pl
from jax.experimental.pallas import tpu as pltpu


def _add_relu_kernel(x_ref, y_ref, o_ref):
    # Elementwise hot path: add + relu on the current VMEM tile (VPU only).
    s = x_ref[...] + y_ref[...]
    o_ref[...] = jnp.maximum(s, jnp.zeros_like(s))


# ~2 MiB per-operand block: 3 refs x 2 pipeline buffers x 2 MiB = 12 MiB,
# safely under v5e's 16 MiB default scoped VMEM and v7x's 32 MiB.
_TARGET_BLOCK_BYTES = 2 * 1024 * 1024


def _add_relu_flat(xf, yf):
    """xf, yf: flat 1-D same-dtype arrays; length is a multiple of 128."""
    total = xf.shape[0]
    dtype_bytes = jnp.dtype(xf.dtype).itemsize

    # Widest lane-dense last dim that divides the length and keeps >= 8 rows
    # (full (8,128) vregs, unmasked lane-dense stores).
    lanes = 128
    for cand in (2048, 1024, 512, 256):
        if total % cand == 0 and total // cand >= 8:
            lanes = cand
            break
    rows = total // lanes

    # Sublane granularity per 32-bit word: 8 rows for f32, 16 for bf16, 32 for i8.
    sublane = max(8, (32 // (dtype_bytes * 8)) * 8)

    block_rows = (_TARGET_BLOCK_BYTES // (lanes * dtype_bytes)) // sublane * sublane
    block_rows = max(sublane, block_rows)
    if block_rows >= rows:
        block_rows = rows  # single full-extent block (legal even if rows % 8 != 0)

    grid = (pl.cdiv(rows, block_rows),)

    x2 = xf.reshape(rows, lanes)
    y2 = yf.reshape(rows, lanes)

    cost = pl.CostEstimate(
        flops=2 * total,               # add + max per element
        transcendentals=0,
        bytes_accessed=3 * total * dtype_bytes,
    )

    out2 = pl.pallas_call(
        _add_relu_kernel,
        out_shape=jax.ShapeDtypeStruct((rows, lanes), xf.dtype),
        grid_spec=pltpu.PrefetchScalarGridSpec(
            num_scalar_prefetch=0,
            grid=grid,
            in_specs=[
                pl.BlockSpec((block_rows, lanes), lambda i: (i, 0)),
                pl.BlockSpec((block_rows, lanes), lambda i: (i, 0)),
            ],
            out_specs=pl.BlockSpec((block_rows, lanes), lambda i: (i, 0)),
        ),
        compiler_params=pltpu.CompilerParams(
            dimension_semantics=("parallel",),  # lets v7x shard steps across its 2 TCs
        ),
        cost_estimate=cost,
    )(x2, y2)

    return out2.reshape(-1)


def add_relu(x, y):
    """Computes relu(x + y) elementwise, matching AddRelu.forward.
    y is broadcast to x.shape (torch add_ semantics); output dtype is x.dtype."""
    if y.shape != x.shape:
        y = jnp.broadcast_to(y, x.shape)
    y = y.astype(x.dtype)

    orig_shape = x.shape
    total = x.size
    xf = x.reshape(-1)
    yf = y.reshape(-1)

    if total % 128 != 0:
        # Odd sizes: pad to a multiple of 8*128 so the tiled lane-dense path is
        # used, then slice the tail away. Costs one extra copy of each input.
        pad = (-total) % 1024
        xf = jnp.pad(xf, (0, pad))
        yf = jnp.pad(yf, (0, pad))
        out = _add_relu_flat(xf, yf)[:total]
    else:
        out = _add_relu_flat(xf, yf)

    return out.reshape(orig_shape)


if __name__ == "__main__":
    key = jax.random.PRNGKey(0)
    kx, ky = jax.random.split(key)

    # NCHW inputs (PyTorch convention), small shapes.
    B, C, H, W = 2, 4, 16, 16
    x = jax.random.normal(kx, (B, C, H, W), dtype=jnp.float32)
    y = jax.random.normal(ky, (B, C, H, W), dtype=jnp.float32)

    out = add_relu(x, y)
    out = jax.block_until_ready(out)

    ref = jnp.maximum(x + y, 0.0)
    assert out.shape == x.shape
    assert jnp.allclose(out, ref, atol=1e-6), "mismatch vs reference"

    # Also exercise the non-multiple-of-128 padding path with a tiny odd shape.
    x_odd = jax.random.normal(kx, (3, 5, 7), dtype=jnp.float32)
    y_odd = jax.random.normal(ky, (3, 5, 7), dtype=jnp.float32)
    out_odd = jax.block_until_ready(add_relu(x_odd, y_odd))
    ref_odd = jnp.maximum(x_odd + y_odd, 0.0)
    assert jnp.allclose(out_odd, ref_odd, atol=1e-6), "mismatch (odd shape)"

    print("KERNEL_OK")
</pallas_src>

<mosaic_0001>
module attributes {stable_mosaic.version = 11 : i64} {
  func.func @_add_relu_kernel(%arg0: i32, %arg1: memref<8x256xf32, #tpu.memory_space<vmem>>, %arg2: memref<8x256xf32, #tpu.memory_space<vmem>>, %arg3: memref<8x256xf32, #tpu.memory_space<vmem>>) attributes {dimension_semantics = [#tpu.dimension_semantics<parallel>], iteration_bounds = array<i64: 1>, scalar_prefetch = 0 : i64, scratch_operands = 0 : i64, tpu.core_type = #tpu.core_type<tc>, window_params = [{transform_indices = @transform_0, window_bounds = array<i64: 8, 256>}, {transform_indices = @transform_1, window_bounds = array<i64: 8, 256>}, {transform_indices = @transform_2, window_bounds = array<i64: 8, 256>}]} {
    %c0 = arith.constant 0 : index
    %c0_0 = arith.constant 0 : index
    %0 = vector.load %arg1[%c0, %c0_0] : memref<8x256xf32, #tpu.memory_space<vmem>>, vector<8x256xf32>
    %c0_1 = arith.constant 0 : index
    %c0_2 = arith.constant 0 : index
    %1 = vector.load %arg2[%c0_1, %c0_2] : memref<8x256xf32, #tpu.memory_space<vmem>>, vector<8x256xf32>
    %2 = arith.addf %0, %1 : vector<8x256xf32>
    %cst = arith.constant 0.000000e+00 : f32
    %3 = vector.broadcast %cst : f32 to vector<8x256xf32>
    %4 = arith.maximumf %2, %3 : vector<8x256xf32>
    %c0_3 = arith.constant 0 : index
    %c0_4 = arith.constant 0 : index
    %5 = vector.load %arg3[%c0_3, %c0_4] : memref<8x256xf32, #tpu.memory_space<vmem>>, vector<8x256xf32>
    tpu.vector_store %arg3[%c0_3, %c0_4], %4 {strides = array<i32>} : memref<8x256xf32, #tpu.memory_space<vmem>>, vector<8x256xf32>,
    return
  }
  func.func @transform_0(%arg0: i32) -> (i32, i32) {
    %c0_i32 = arith.constant 0 : i32
    %c0_i32_0 = arith.constant 0 : i32
    return %arg0, %c0_i32 : i32, i32
  }
  func.func @transform_1(%arg0: i32) -> (i32, i32) {
    %c0_i32 = arith.constant 0 : i32
    %c0_i32_0 = arith.constant 0 : i32
    return %arg0, %c0_i32 : i32, i32
  }
  func.func @transform_2(%arg0: i32) -> (i32, i32) {
    %c0_i32 = arith.constant 0 : i32
    %c0_i32_0 = arith.constant 0 : i32
    return %arg0, %c0_i32 : i32, i32
  }
}

</mosaic_0001>

<bundles_post_ra>
// kernel: tpu_custom_call.1
= control target key start
LH: loop header
LB: loop body
LE: loop exit
PB: predicated region body
PF: predicated region fallthrough
CT: control target
= control target key end

     0   :  { %7 = vsyncpa [#allocation3], 0  ;;  %s191_s0 = inlined_call_operand.hbm [shape: f32[8,256], index: 0, kind: input, shape index: {}]   ;;  %s192_s1 = inlined_call_operand.hbm [shape: f32[8,256], index: 1, kind: input, shape index: {}]   ;;  %s193_s2 = inlined_call_operand.hbm [shape: f32[8,256], index: 2, kind: output, shape index: {}]  }
   0x1   :  { %8 = vsyncpa [#allocation6], 0 }
   0x2   :  { %9 = vsyncpa [#allocation4], 0  ;;  %s137_s9 = smov [#allocation2]   ;;  %s138_s11 = smov [#allocation5]  }
   0x3   :  { %s16_s10 = sshll.u32 %s137_s9, 4  ;;  %s26_s12 = sshll.u32 %s138_s11, 4  ;;  %s17_s10 = int_to_ptr.vmem [resolvable:$true] %s16_s10  ;;  %s27_s12 = int_to_ptr.vmem [resolvable:$true] %s26_s12 }
   0x4   :  { %s65_s15 = scalar_lea.hbm %s191_s0, 256 }
   0x5   :  { %p66_p0 = scmp.ne.s32.totalorder %s191_s0, %s65_s15  ;;  %p69_p1 = scmp.lt.u32.totalorder %s65_s15, %s191_s0 }
   0x7   :  { %p71_p2 = pnand %p69_p1, %p66_p0 }
   0x9   :  { %74 = shalt.err (!%p71_p2)
}
   0xa   :  { %s75_s20 = scalar_lea.vmem %s17_s10, 256  ;;  %p80_p4 = scmp.lt.s32.totalorder %s17_s10, %s17_s10 }
   0xb   :  { %p76_p3 = scmp.ne.s32.totalorder %s17_s10, %s75_s20  ;;  %p81_p5 = scmp.lt.s32.totalorder %s75_s20, %s75_s20 }
   0xd   :  { %p82_p6 = por %p81_p5, %p80_p4 }
   0xf   :  { %p83_p7 = pnand %p82_p6, %p76_p3 }
  0x11   :  { %86 = shalt.err (!%p83_p7)
}
  0x12   :  { %19 = dma.hbm_to_vmem [thread:$0]  %s191_s0, 256, %s17_s10, [#allocation3]  }
  0x13   :  { %s87_s25 = scalar_lea.hbm %s192_s1, 256 }
  0x14   :  { %p88_p8 = scmp.ne.s32.totalorder %s192_s1, %s87_s25  ;;  %p91_p9 = scmp.lt.u32.totalorder %s87_s25, %s192_s1 }
  0x16   :  { %p93_p10 = pnand %p91_p9, %p88_p8 }
  0x18   :  { %96 = shalt.err (!%p93_p10)
}
  0x19   :  { %s97_s30 = scalar_lea.vmem %s27_s12, 256  ;;  %p102_p12 = scmp.lt.s32.totalorder %s27_s12, %s27_s12 }
  0x1a   :  { %p98_p11 = scmp.ne.s32.totalorder %s27_s12, %s97_s30  ;;  %p103_p13 = scmp.lt.s32.totalorder %s97_s30, %s97_s30 }
  0x1c   :  { %p104_p0 = por %p103_p13, %p102_p12 }
  0x1e   :  { %p105_p1 = pnand %p104_p0, %p98_p11 }
  0x20   :  { %108 = shalt.err (!%p105_p1)
}
  0x21   :  { %29 = dma.hbm_to_vmem [thread:$0]  %s192_s1, 256, %s27_s12, [#allocation6]  }
  0x22   :  { %131 = dma.done.wait [#allocation3], 256  }
  0x23   :  { %132 = vsyncadd [#allocation3], 4294967040 }
  0x24   :  { %133 = dma.done.wait [#allocation6], 256  }
  0x25   :  { %134 = vsyncadd [#allocation6], 4294967040  ;;  %v36_v0 = vld [vmem:[#allocation2] sm:$0xff]  ;;  %v38_v1 = vld [vmem:[#allocation5] sm:$0xff]  ;;  %s139_s4 = smov [#allocation7]  }
  0x26   :  { %v37_v2 = vld [vmem:[#allocation2 + $0x8] sm:$0xff]  ;;  %v40_v3 = vadd.f32 %v38_v1, %v36_v0  ;;  %v39_v4 = vld [vmem:[#allocation5 + $0x8] sm:$0xff]  ;;  %s52_s5 = sshll.u32 %s139_s4, 4  ;;  %s53_s5 = int_to_ptr.vmem [resolvable:$true] %s52_s5 }
  0x27   :  { %v41_v5 = vadd.f32 %v39_v4, %v37_v2  ;;  %s109_s6 = scalar_lea.vmem %s53_s5, 256  ;;  %p114_p3 = scmp.lt.s32.totalorder %s53_s5, %s53_s5 }
  0x28   :  { %v42_v6 = vmax.f32 %v40_v3, 0.0  ;;  %p110_p2 = scmp.ne.s32.totalorder %s53_s5, %s109_s6  ;;  %p115_p4 = scmp.lt.s32.totalorder %s109_s6, %s109_s6 }
  0x29   :  { %v43_v7 = vmax.f32 %v41_v5, 0.0 }
  0x2a   :  { %44 = vst [vmem:[#allocation7] sm:$0xff] %v42_v6  ;;  %p116_p5 = por %p115_p4, %p114_p3 }
  0x2b   :  { %45 = vst [vmem:[#allocation7 + $0x8] sm:$0xff] %v43_v7 }
  0x2c   :  { %p117_p6 = pnand %p116_p5, %p110_p2 }
  0x2e   :  { %120 = shalt.err (!%p117_p6)
}
  0x2f   :  { %s121_s8 = scalar_lea.hbm %s193_s2, 256 }
  0x30   :  { %p122_p7 = scmp.ne.s32.totalorder %s193_s2, %s121_s8  ;;  %p125_p8 = scmp.lt.u32.totalorder %s121_s8, %s193_s2 }
  0x32   :  { %p127_p9 = pnand %p125_p8, %p122_p7 }
  0x34   :  { %130 = shalt.err (!%p127_p9)
}
  0x35   :  { %55 = dma.vmem_to_hbm [thread:$0]  %s53_s5, 256, %s193_s2, [#allocation4]  }
  0x36   :  { %135 = dma.done.wait [#allocation4], 256  }
  0x37   :  { %136 = vsyncadd [#allocation4], 4294967040 }
  0x38   :  { %59 = vsyncpa [#allocation3], 1 }
  0x39   :  { %60 = vsyncpa [#allocation6], 1 }
  0x3a   :  { %61 = vsyncpa [#allocation4], 1 }

</bundles_post_ra>
